<compile_context>
chip_gen: v7x
topology: tpu7x:2x2x1
jax: 0.10.0
libtpu: 0.0.40
codegen_flags: <defaults>
</compile_context>

<pallas_src>
import functools

import jax
import jax.numpy as jnp
from jax.experimental import pallas as pl
from jax.experimental.pallas import tpu as pltpu

_ROW_GRAN = 16            # bf16 sublane packing: 16 rows per packed sublane pair
_VMEM = pltpu.MemorySpace.VMEM
_VMEM_BUDGET = 12 * 1024 * 1024   # conservative: fits v5e's 16 MiB scoped default


def _round_up(x, m):
    return ((x + m - 1) // m) * m


def _vmem_footprint(tb, d_in, hidden, d_out):
    """Estimated VMEM bytes: double-buffered weight/bias blocks + per-tile buffers."""
    resident = 2 * ((d_in * hidden + hidden * d_out) * 2 + (hidden + d_out) * 4)
    per_row = (2 * d_in * 4          # double-buffered f32 x tile
               + 2 * d_out * 4       # double-buffered f32 out tile
               + d_in * 2            # in-kernel bf16 cast of x
               + hidden * 4          # f32 hidden activation
               + hidden * 2          # bf16 cast of hidden activation
               + d_out * 4)          # f32 logits
    return resident, per_row, resident + tb * per_row


def _choose_batch_tile(batch, d_in, hidden, d_out):
    """Largest batch tile (multiple of 16, <=2048) fitting the VMEM budget,
    forced to give >=2 grid steps (v7x dual-TC) when the batch allows."""
    tb = 2048
    while tb > _ROW_GRAN:
        _, _, total = _vmem_footprint(tb, d_in, hidden, d_out)
        if total <= _VMEM_BUDGET:
            break
        tb //= 2
    tb = max(_ROW_GRAN, tb)
    b_gran = _round_up(batch, _ROW_GRAN)
    tb = min(tb, b_gran)
    # Guarantee at least 2 grid steps so the "parallel" axis shards across v7x's 2 TCs.
    if b_gran // tb < 2 and b_gran >= 2 * _ROW_GRAN:
        tb = max(_ROW_GRAN, (b_gran // 2) // _ROW_GRAN * _ROW_GRAN)
    return tb


def _mlp_policy_kernel(x_ref, w1_ref, b1_ref, w2_ref, b2_ref, o_ref, *, use_tanh):
    # Layer 1: cast x to bf16 in-kernel (VPU, hidden under the matmul), MXU matmul with
    # f32 accumulation, bias + ReLU in f32 on the VPU.
    x = x_ref[...].astype(jnp.bfloat16)
    h = jnp.dot(x, w1_ref[...], preferred_element_type=jnp.float32)
    h = jnp.maximum(h + b1_ref[...], 0.0)

    # Layer 2: bf16 operands on the MXU, f32 accumulate, f32 bias.
    logits = jnp.dot(h.astype(w2_ref.dtype), w2_ref[...],
                     preferred_element_type=jnp.float32)
    logits = logits + b2_ref[...]

    if use_tanh:
        # Critic head (output_size == 1): tanh.
        o_ref[...] = jnp.tanh(logits)
    else:
        # Actor head: numerically-stable softmax over the (true-width) last axis.
        m = jnp.max(logits, axis=-1, keepdims=True)
        e = jnp.exp(logits - m)
        o_ref[...] = e / jnp.sum(e, axis=-1, keepdims=True)


def prepare_params(w1, b1, w2, b2):
    """One-time parameter preprocessing (hoisted out of the per-call forward):
    bf16 weights for the MXU, f32 row-vector biases."""
    w1_c = jnp.asarray(w1, jnp.bfloat16)
    b1_c = jnp.reshape(jnp.asarray(b1, jnp.float32), (1, -1))
    w2_c = jnp.asarray(w2, jnp.bfloat16)
    b2_c = jnp.reshape(jnp.asarray(b2, jnp.float32), (1, -1))
    return w1_c, b1_c, w2_c, b2_c


def unified_policy_forward(x, params, *, batch_tile=None):
    """Pallas forward pass for UnifiedPolicyNetwork.

    x:      (B, input_size) float32
    params: output of prepare_params(w1, b1, w2, b2)
    """
    w1_c, b1_c, w2_c, b2_c = params
    x = jnp.asarray(x, jnp.float32)
    B, d_in = x.shape
    hidden = w1_c.shape[1]
    d_out = w2_c.shape[1]

    tb = batch_tile if batch_tile is not None else _choose_batch_tile(B, d_in, hidden, d_out)
    tb = max(_ROW_GRAN, _round_up(tb, _ROW_GRAN))
    b_pad = _round_up(B, tb)

    # Pad the batch only when needed (no bf16 copy of x in the wrapper).
    x_p = x if b_pad == B else jnp.zeros((b_pad, d_in), jnp.float32).at[:B].set(x)

    kernel = functools.partial(_mlp_policy_kernel, use_tanh=(d_out == 1))

    flops = 2 * b_pad * d_in * hidden + 2 * b_pad * hidden * d_out
    bytes_accessed = (b_pad * d_in * 4
                      + w1_c.size * 2 + b1_c.size * 4
                      + w2_c.size * 2 + b2_c.size * 4
                      + b_pad * d_out * 4)
    cost = pl.CostEstimate(flops=flops,
                           transcendentals=b_pad * d_out,
                           bytes_accessed=bytes_accessed)

    _, _, footprint = _vmem_footprint(tb, d_in, hidden, d_out)
    vmem_limit = min(32 * 1024 * 1024, max(16 * 1024 * 1024, footprint + (4 << 20)))

    out = pl.pallas_call(
        kernel,
        out_shape=jax.ShapeDtypeStruct((b_pad, d_out), jnp.float32),
        grid=(b_pad // tb,),
        in_specs=[
            pl.BlockSpec((tb, d_in), lambda i: (i, 0), memory_space=_VMEM),        # x tile
            pl.BlockSpec((d_in, hidden), lambda i: (0, 0), memory_space=_VMEM),    # w1 (resident)
            pl.BlockSpec((1, hidden), lambda i: (0, 0), memory_space=_VMEM),       # b1 (resident)
            pl.BlockSpec((hidden, d_out), lambda i: (0, 0), memory_space=_VMEM),   # w2 (resident)
            pl.BlockSpec((1, d_out), lambda i: (0, 0), memory_space=_VMEM),        # b2 (resident)
        ],
        out_specs=pl.BlockSpec((tb, d_out), lambda i: (i, 0), memory_space=_VMEM),
        compiler_params=pltpu.CompilerParams(
            dimension_semantics=("parallel",),
            vmem_limit_bytes=vmem_limit,
        ),
        cost_estimate=cost,
    )(x_p, w1_c, b1_c, w2_c, b2_c)

    # Only batch padding (if any) to strip — output is already the true width.
    return out if b_pad == B else out[:B]


def init_params(key, input_size, hidden_size, output_size):
    """Deterministic init mimicking PyTorch nn.Linear default (uniform +/- 1/sqrt(fan_in))."""
    k1, k2, k3, k4 = jax.random.split(key, 4)
    bound1 = 1.0 / jnp.sqrt(jnp.float32(input_size))
    bound2 = 1.0 / jnp.sqrt(jnp.float32(hidden_size))
    w1 = jax.random.uniform(k1, (input_size, hidden_size), jnp.float32, -bound1, bound1)
    b1 = jax.random.uniform(k2, (1, hidden_size), jnp.float32, -bound1, bound1)
    w2 = jax.random.uniform(k3, (hidden_size, output_size), jnp.float32, -bound2, bound2)
    b2 = jax.random.uniform(k4, (1, output_size), jnp.float32, -bound2, bound2)
    return w1, b1, w2, b2


def reference_forward(x, w1, b1, w2, b2):
    h = jnp.maximum(x @ w1 + b1, 0.0)
    out = h @ w2 + b2
    if out.shape[-1] == 1:
        return jnp.tanh(out)
    return jax.nn.softmax(out, axis=-1)


if __name__ == "__main__":
    key = jax.random.PRNGKey(0)
    k_x, k_p1, k_p2, k_x2 = jax.random.split(key, 4)

    batch = 2
    input_size = 16
    hidden_size = 32

    # --- Actor-style head: output_size > 1 -> softmax over last dim ---
    output_size = 4
    x = jax.random.normal(k_x, (batch, input_size), jnp.float32)
    w1, b1, w2, b2 = init_params(k_p1, input_size, hidden_size, output_size)
    actor_params = prepare_params(w1, b1, w2, b2)   # one-time weight prep
    y = jax.block_until_ready(unified_policy_forward(x, actor_params))
    y_ref = reference_forward(x, w1, b1, w2, b2)
    assert y.shape == (batch, output_size)
    assert jnp.allclose(y, y_ref, atol=2e-2, rtol=2e-2)  # bf16 matmuls
    assert jnp.allclose(jnp.sum(y, axis=-1), 1.0, atol=1e-3)  # exact softmax normalization

    # --- Critic-style head: output_size == 1 -> tanh ---
    w1c, b1c, w2c, b2c = init_params(k_p2, input_size, hidden_size, 1)
    critic_params = prepare_params(w1c, b1c, w2c, b2c)
    yc = jax.block_until_ready(unified_policy_forward(x, critic_params))
    yc_ref = reference_forward(x, w1c, b1c, w2c, b2c)
    assert yc.shape == (batch, 1)
    assert jnp.allclose(yc, yc_ref, atol=2e-2, rtol=2e-2)

    # --- Exercise the batch grid + padding path (B not a multiple of the tile, grid > 1) ---
    xb = jax.random.normal(k_x2, (20, input_size), jnp.float32)
    yb = jax.block_until_ready(unified_policy_forward(xb, actor_params, batch_tile=16))
    yb_ref = reference_forward(xb, w1, b1, w2, b2)
    assert yb.shape == (20, output_size)
    assert jnp.allclose(yb, yb_ref, atol=2e-2, rtol=2e-2)

    # --- Default tile selection with >= 2 grid steps (dual-TC path on v7x) ---
    xw = jax.random.normal(k_x2, (40, input_size), jnp.float32)
    yw = jax.block_until_ready(unified_policy_forward(xw, actor_params))
    yw_ref = reference_forward(xw, w1, b1, w2, b2)
    assert yw.shape == (40, output_size)
    assert jnp.allclose(yw, yw_ref, atol=2e-2, rtol=2e-2)

    print("KERNEL_OK")
</pallas_src>

<mosaic_0001>
module attributes {stable_mosaic.version = 11 : i64} {
  func.func @_mlp_policy_kernel(%arg0: i32, %arg1: memref<16x16xf32, #tpu.memory_space<vmem>>, %arg2: memref<16x32xbf16, #tpu.memory_space<vmem>>, %arg3: memref<1x32xf32, #tpu.memory_space<vmem>>, %arg4: memref<32x4xbf16, #tpu.memory_space<vmem>>, %arg5: memref<1x4xf32, #tpu.memory_space<vmem>>, %arg6: memref<16x4xf32, #tpu.memory_space<vmem>>) attributes {dimension_semantics = [#tpu.dimension_semantics<parallel>], iteration_bounds = array<i64: 1>, scalar_prefetch = 0 : i64, scratch_operands = 0 : i64, tpu.core_type = #tpu.core_type<tc>, window_params = [{transform_indices = @transform_0, window_bounds = array<i64: 16, 16>}, {pipeline_mode = #tpu.pipeline_mode<synchronous>, transform_indices = @transform_1, window_bounds = array<i64: 16, 32>}, {pipeline_mode = #tpu.pipeline_mode<synchronous>, transform_indices = @transform_2, window_bounds = array<i64: 1, 32>}, {pipeline_mode = #tpu.pipeline_mode<synchronous>, transform_indices = @transform_3, window_bounds = array<i64: 32, 4>}, {pipeline_mode = #tpu.pipeline_mode<synchronous>, transform_indices = @transform_4, window_bounds = array<i64: 1, 4>}, {transform_indices = @transform_5, window_bounds = array<i64: 16, 4>}]} {
    %c0 = arith.constant 0 : index
    %c0_0 = arith.constant 0 : index
    %0 = vector.load %arg1[%c0, %c0_0] : memref<16x16xf32, #tpu.memory_space<vmem>>, vector<16x16xf32>
    %1 = arith.truncf %0 : vector<16x16xf32> to vector<16x16xbf16>
    %c0_1 = arith.constant 0 : index
    %c0_2 = arith.constant 0 : index
    %2 = vector.load %arg2[%c0_1, %c0_2] : memref<16x32xbf16, #tpu.memory_space<vmem>>, vector<16x32xbf16>
    %cst = arith.constant dense<0.000000e+00> : vector<16x32xf32>
    %3 = tpu.matmul %1, %2, %cst {dimension_numbers = #tpu.dot_dimension_numbers<[1], [0], [0], [1], [0, 0, 1, 1], [], []>} : vector<16x16xbf16>, vector<16x32xbf16>, vector<16x32xf32> -> vector<16x32xf32>
    %c0_3 = arith.constant 0 : index
    %c0_4 = arith.constant 0 : index
    %4 = vector.load %arg3[%c0_3, %c0_4] : memref<1x32xf32, #tpu.memory_space<vmem>>, vector<1x32xf32>
    %5 = vector.broadcast %4 : vector<1x32xf32> to vector<16x32xf32>
    %6 = arith.addf %3, %5 : vector<16x32xf32>
    %cst_5 = arith.constant 0.000000e+00 : f32
    %7 = vector.broadcast %cst_5 : f32 to vector<16x32xf32>
    %8 = arith.maximumf %6, %7 : vector<16x32xf32>
    %9 = arith.truncf %8 : vector<16x32xf32> to vector<16x32xbf16>
    %c0_6 = arith.constant 0 : index
    %c0_7 = arith.constant 0 : index
    %10 = vector.load %arg4[%c0_6, %c0_7] : memref<32x4xbf16, #tpu.memory_space<vmem>>, vector<32x4xbf16>
    %cst_8 = arith.constant dense<0.000000e+00> : vector<16x4xf32>
    %11 = tpu.matmul %9, %10, %cst_8 {dimension_numbers = #tpu.dot_dimension_numbers<[1], [0], [0], [1], [0, 0, 1, 1], [], []>} : vector<16x32xbf16>, vector<32x4xbf16>, vector<16x4xf32> -> vector<16x4xf32>
    %c0_9 = arith.constant 0 : index
    %c0_10 = arith.constant 0 : index
    %12 = vector.load %arg5[%c0_9, %c0_10] : memref<1x4xf32, #tpu.memory_space<vmem>>, vector<1x4xf32>
    %13 = vector.broadcast %12 : vector<1x4xf32> to vector<16x4xf32>
    %14 = arith.addf %11, %13 : vector<16x4xf32>
    %cst_11 = arith.constant dense<0xFF800000> : vector<16xf32>
    %15 = vector.multi_reduction <maximumf>, %14, %cst_11 [1] : vector<16x4xf32> to vector<16xf32>
    %16 = vector.shape_cast %15 : vector<16xf32> to vector<16x1xf32>
    %17 = vector.broadcast %16 : vector<16x1xf32> to vector<16x4xf32>
    %18 = arith.subf %14, %17 : vector<16x4xf32>
    %19 = math.exp %18 : vector<16x4xf32>
    %cst_12 = arith.constant dense<0.000000e+00> : vector<16xf32>
    %20 = vector.multi_reduction <add>, %19, %cst_12 [1] : vector<16x4xf32> to vector<16xf32>
    %21 = vector.shape_cast %20 : vector<16xf32> to vector<16x1xf32>
    %22 = vector.broadcast %21 : vector<16x1xf32> to vector<16x4xf32>
    %23 = arith.divf %19, %22 : vector<16x4xf32>
    %c0_13 = arith.constant 0 : index
    %c0_14 = arith.constant 0 : index
    %24 = vector.load %arg6[%c0_13, %c0_14] : memref<16x4xf32, #tpu.memory_space<vmem>>, vector<16x4xf32>
    tpu.vector_store %arg6[%c0_13, %c0_14], %23 {strides = array<i32>} : memref<16x4xf32, #tpu.memory_space<vmem>>, vector<16x4xf32>,
    return
  }
  func.func @transform_0(%arg0: i32) -> (i32, i32) {
    %c0_i32 = arith.constant 0 : i32
    %c0_i32_0 = arith.constant 0 : i32
    return %arg0, %c0_i32 : i32, i32
  }
  func.func @transform_1(%arg0: i32) -> (i32, i32) {
    %c0_i32 = arith.constant 0 : i32
    %c0_i32_0 = arith.constant 0 : i32
    %c0_i32_1 = arith.constant 0 : i32
    return %c0_i32, %c0_i32_0 : i32, i32
  }
  func.func @transform_2(%arg0: i32) -> (i32, i32) {
    %c0_i32 = arith.constant 0 : i32
    %c0_i32_0 = arith.constant 0 : i32
    %c0_i32_1 = arith.constant 0 : i32
    return %c0_i32, %c0_i32_0 : i32, i32
  }
  func.func @transform_3(%arg0: i32) -> (i32, i32) {
    %c0_i32 = arith.constant 0 : i32
    %c0_i32_0 = arith.constant 0 : i32
    %c0_i32_1 = arith.constant 0 : i32
    return %c0_i32, %c0_i32_0 : i32, i32
  }
  func.func @transform_4(%arg0: i32) -> (i32, i32) {
    %c0_i32 = arith.constant 0 : i32
    %c0_i32_0 = arith.constant 0 : i32
    %c0_i32_1 = arith.constant 0 : i32
    return %c0_i32, %c0_i32_0 : i32, i32
  }
  func.func @transform_5(%arg0: i32) -> (i32, i32) {
    %c0_i32 = arith.constant 0 : i32
    %c0_i32_0 = arith.constant 0 : i32
    return %arg0, %c0_i32 : i32, i32
  }
}

</mosaic_0001>

<bundles_post_ra>
// kernel: tpu_custom_call.1
= control target key start
LH: loop header
LB: loop body
LE: loop exit
PB: predicated region body
PF: predicated region fallthrough
CT: control target
= control target key end

     0   :  { %10 = vsyncpa [#allocation3], 0  ;;  %s265_s18 = smov [#allocation2]   ;;  %s342_s0 = inlined_call_operand.vmem [shape: f32[16,16], index: 0, kind: input, shape index: {}]   ;;  %s343_s1 = inlined_call_operand.hbm [shape: bf16[16,32], index: 1, kind: input, shape index: {}]   ;;  %s344_s2 = inlined_call_operand.vmem [shape: f32[1,32], index: 2, kind: input, shape index: {}]   ;;  %s345_s3 = inlined_call_operand.vmem [shape: bf16[32,4], index: 3, kind: input, shape index: {}]   ;;  %s346_s4 = inlined_call_operand.vmem [shape: f32[1,4], index: 4, kind: input, shape index: {}]   ;;  %s347_s5 = inlined_call_operand.vmem [shape: f32[16,4], index: 5, kind: output, shape index: {}]  }
   0x1   :  { %s18_s19 = sshll.u32 %s265_s18, 4  ;;  %s241_s22 = scalar_lea.hbm %s343_s1, 128  ;;  %s19_s19 = int_to_ptr.vmem [resolvable:$true] %s18_s19 }
   0x2   :  { %p242_p0 = scmp.ne.s32.totalorder %s343_s1, %s241_s22  ;;  %p245_p1 = scmp.lt.u32.totalorder %s241_s22, %s343_s1 }
   0x4   :  { %p247_p2 = pnand %p245_p1, %p242_p0 }
   0x6   :  { %250 = shalt.err (!%p247_p2)
}
   0x7   :  { %s251_s27 = scalar_lea.vmem %s19_s19, 128  ;;  %p256_p4 = scmp.lt.s32.totalorder %s19_s19, %s19_s19 }
   0x8   :  { %p252_p3 = scmp.ne.s32.totalorder %s19_s19, %s251_s27  ;;  %p257_p5 = scmp.lt.s32.totalorder %s251_s27, %s251_s27 }
   0xa   :  { %p258_p6 = por %p257_p5, %p256_p4 }
   0xc   :  { %p259_p7 = pnand %p258_p6, %p252_p3 }
   0xe   :  { %262 = shalt.err (!%p259_p7)
}
   0xf   :  { %s266_s28 = smov 64   ;;  %s267_s29 = smov 4  }
  0x10   :  { %24 = dma.hbm_to_vmem [thread:$0]  %s343_s1, 128, %s19_s19, [#allocation3], %s266_s28, %s266_s28, %s267_s29  }
  0x11   :  { %263 = dma.done.wait [#allocation3], 128  }
  0x12   :  { %264 = vsyncadd [#allocation3], 4294967168  ;;  %v268_v0 = vmov 0.0   ;;  %vm269_vm0 = vmmov 0   ;;  %v230_v1 = vld [vmem:[#allocation2] sm:$0xff]   ;;  %v36_v3 = vld [vmem:[%s342_s0 + $0x8] sm:$0xff] }
  0x13   :  { %211 = vmatprep.subr.bf16.mxu0 %v268_v0  ;;  %213 = vmatprep.mubr.msk.bf16.mxu0 %vm269_vm0, %v268_v0  ;;  %v35_v2 = vld [vmem:[%s342_s0] sm:$0xff]  ;;  %vm53_vm1 = vcmask 130048   ;;  %v232_v6 = vld [vmem:[%s345_s3 + $0x8] sm:$0xff]   ;;  %vm124_vm2 = vcmask 261120   ;;  %vm169_vm3 = vcmask 31744  }
  0x14   :  { %217 = vmatprep.subr.bf16.mxu1 %v268_v0  ;;  %221 = vmatprep.mubr.msk.bf16.mxu1 %vm269_vm0, %v268_v0  ;;  %v37_v4 = vpack.c.bf16 %v36_v3, %v35_v2  ;;  %v231_v5 = vld [vmem:[%s345_s3] sm:$0xff]  }
  0x15   :  { %212 = vmatpush3.bf16.msra.mxu0 %v230_v1  ;;  %218 = vmatpush3.bf16.msra.mxu1 %v231_v5  ;;  %v199_v7 = vld [vmem:[%s344_s2] ss:$0 sm:$0xff] }
  0x16   :  { %219 = vmatprep.subr.bf16.mxu1 %v268_v0  ;;  %v202_v17 = vld [vmem:[%s346_s4] ss:$0 sm:$0xff] }
  0x18   :  { %214 = vmatmul.mubr.msk.bf16.vlgmr.msra.gmra.mrb[0].mxu0 %vm53_vm1, %v37_v4 }
  0x19   :  { %220 = vmatpush3.bf16.msra.mxu1 %v232_v6 }
  0xeb   :  { %v91_v8 = vpop.f32.mrb[0].mxu0 }
  0xec   :  { %v92_v9 = vadd.f32 %v199_v7, %v91_v8  ;;  %v215_v10 = vpop.f32.mrb[1].mxu0 }
  0xed   :  { %v94_v11 = vpop.f32.mrb[2].mxu0 }
  0xee   :  { %v95_v12 = vadd.f32 %v199_v7, %v94_v11  ;;  %v216_v13 = vpop.f32.mrb[3].mxu0  ;;  %v98_v14 = vmax.f32 %v92_v9, 0.0 }
  0xf0   :  { %v99_v15 = vmax.f32 %v95_v12, 0.0 }
  0xf2   :  { %v100_v16 = vpack.c.bf16 %v99_v15, %v98_v14 }
  0xf4   :  { %222 = vmatmul.mubr.msk.bf16.vlgmr.msra.gmra.mrb[0].mxu1 %vm124_vm2, %v100_v16 }
 0x1c7   :  { %v162_v18 = vpop.f32.mrb[0].mxu1 }
 0x1c8   :  { %v163_v19 = vadd.f32 %v202_v17, %v162_v18  ;;  %v223_v20 = vpop.f32.mrb[1].mxu1 }
 0x1c9   :  { %v165_v21 = vpop.f32.mrb[2].mxu1 }
 0x1ca   :  { %v166_v22 = vadd.f32 %v202_v17, %v165_v21  ;;  %v224_v23 = vpop.f32.mrb[3].mxu1  ;;  %v170_v24 = vsel %vm169_vm3, %v163_v19, -inf }
 0x1cb   :  { %171 = vmax.xlane.f32.xlu0 %v170_v24 }
 0x1cc   :  { %v173_v25 = vsel %vm169_vm3, %v166_v22, -inf }
 0x1cf   :  { %174 = vmax.xlane.f32.xlu0 %v173_v25 }
 0x258   :  { %v172_v26 = vpop.xlane.xlu0 %171 }
 0x259   :  { %v176_v27 = vsub.f32 %v163_v19, %v172_v26 }
 0x25b   :  { %v178_v28 = vmul.f32 1.442695, %v176_v27 }
 0x25c   :  { %v175_v29 = vpop.xlane.xlu0 %174 }
 0x25d   :  { %233 = vpow2.f32 %v178_v28  ;;  %v177_v30 = vsub.f32 %v166_v22, %v175_v29 }
 0x25f   :  { %v180_v31 = vmul.f32 1.442695, %v177_v30 }
 0x261   :  { %235 = vpow2.f32 %v180_v31 }
 0x267   :  { %v234_v32 = vpop.eup %233 }
 0x268   :  { %v182_v33 = vsel %vm169_vm3, %v234_v32, 0.0 }
 0x269   :  { %183 = vadd.xlane.f32.xlu1 %v182_v33 }
 0x26b   :  { %v236_v34 = vpop.eup %235 }
 0x26c   :  { %v185_v35 = vsel %vm169_vm3, %v236_v34, 0.0 }
 0x26d   :  { %186 = vadd.xlane.f32.xlu1 %v185_v35 }
 0x2f6   :  { %v184_v36 = vpop.xlane.xlu1 %183 }
 0x2f7   :  { %237 = vrcp.f32 %v184_v36 }
 0x2fa   :  { %v187_v37 = vpop.xlane.xlu1 %186 }
 0x2fb   :  { %239 = vrcp.f32 %v187_v37 }
 0x301   :  { %v238_v38 = vpop.eup %237 }
 0x302   :  { %v189_v39 = vmul.f32 %v238_v38, %v234_v32 }
 0x304   :  { %192 = vst.msk [vmem:[%s347_s5] sm:$0xff] %vm169_vm3, %v189_v39 }
 0x305   :  { %v240_v40 = vpop.eup %239 }
 0x306   :  { %v191_v41 = vmul.f32 %v240_v40, %v236_v34 }
 0x308   :  { %193 = vst.msk [vmem:[%s347_s5 + $0x8] sm:$0xff] %vm169_vm3, %v191_v41 }
 0x309   :  { %198 = vsyncpa [#allocation3], 1 }

</bundles_post_ra>
